<compile_context>
chip_gen: v6e
topology: v6e:2x2x1
jax: 0.10.0
libtpu: 0.0.40
codegen_flags: <defaults>
</compile_context>

<pallas_src>
import math

import jax
import jax.numpy as jnp
import numpy as np
from jax.experimental import pallas as pl
from jax.experimental.pallas import tpu as pltpu

_LANE = 128


def siren_str_tfm_kernel(amp_ref, bias_ref, x_ref, o_ref):
    """Elementwise FMA: o = amp * x + bias, computed in f32.

    amp_ref / bias_ref : (1, TP, L)  f32 lane-periodic modulation slab
    x_ref / o_ref      : (1, T,  L)  input dtype; T % TP == 0 when TP > 1
    """
    tp = amp_ref.shape[1]
    x = x_ref[...].astype(jnp.float32)
    if tp == 1:
        y = amp_ref[...] * x + bias_ref[...]
    else:
        _, t, l = x_ref.shape
        # TP is a multiple of the sublane count, so this reshape is a free view.
        x4 = x.reshape(1, t // tp, tp, l)
        y = (amp_ref[...].reshape(1, 1, tp, l) * x4
             + bias_ref[...].reshape(1, 1, tp, l)).reshape(1, t, l)
    o_ref[...] = y.astype(o_ref.dtype)


def siren_str_tfm(x_i, q_i, w, b, *, max_block_bytes=4 << 20):
    """x_i: (N, S, H), q_i: (N, C), w: (C, 2H), b: (1, 2H) -> (N, S, H).

    `w` is the q_transform weight stored as (in, out) = W^T; `b` its bias.
    """
    N, S, H = x_i.shape
    C = q_i.shape[-1]
    assert w.shape == (C, 2 * H) and b.shape == (1, 2 * H)
    dtype = x_i.dtype
    itemsize = jnp.dtype(dtype).itemsize
    sm = max(8, 32 // itemsize)          # sublane multiple: f32->8, bf16->16, int8->32

    # ---- hoisted q_transform (tiny; done once in XLA, not per grid step) ----
    qt = (jnp.dot(q_i.astype(jnp.float32), w.astype(jnp.float32),
                  preferred_element_type=jnp.float32)
          + b.astype(jnp.float32))                          # (N, 2H) f32
    amp, bias = qt[:, :H], qt[:, H:]                        # (N, H) f32, kept f32

    # ---- lane-dense layout whenever the (S, H) slab flattens onto 128 lanes ----
    lane_dense = (S * H) % _LANE == 0
    if lane_dense:
        period = math.lcm(H, _LANE)      # flat period of the amp/bias pattern
        P = period // _LANE              # 128-lane rows per period
        rows = (S * H) // _LANE
        TP = 1 if P == 1 else math.lcm(P, sm)
        if P > 1 and rows < TP:
            lane_dense = False           # degenerate tiny case: keep (S, H) layout

    if lane_dense:
        L = _LANE
        x2 = x_i.reshape(N, rows, L)
        reps = period // H
        amp2 = jnp.tile(amp, (1, reps)).reshape(N, P, L)
        bias2 = jnp.tile(bias, (1, reps)).reshape(N, P, L)
        if TP > P:
            amp2 = jnp.tile(amp2, (1, TP // P, 1))
            bias2 = jnp.tile(bias2, (1, TP // P, 1))
    else:
        # TODO(synk): when S*H is not a multiple of 128 the (S, H) layout is kept;
        # stores are masked (vst.msk) for H not a multiple of 128.
        L, rows, TP = H, S, 1
        x2 = x_i
        amp2 = amp[:, None, :]
        bias2 = bias[:, None, :]

    # ---- tile sizing: big blocks within a VMEM budget, no full-slab fallback ----
    unit = TP if TP > 1 else sm
    bytes_per_row = L * itemsize
    max_rows = max(unit, (max_block_bytes // bytes_per_row // unit) * unit)
    if rows <= unit:
        row_tile = rows                  # full-extent sublane dim (allowed)
    else:
        row_tile = min(max_rows, (rows // unit) * unit)
        # Expose >= 2 parallel grid steps so v7x's second TensorCore gets work.
        if N * pl.cdiv(rows, row_tile) < 2:
            row_tile = max(unit, pl.cdiv(rows, 2 * unit) * unit)

    grid = (N, pl.cdiv(rows, row_tile))
    block_bytes = row_tile * bytes_per_row
    vmem_limit = int(min(48 << 20, max(32 << 20, 6 * block_bytes)))

    out2 = pl.pallas_call(
        siren_str_tfm_kernel,
        out_shape=jax.ShapeDtypeStruct((N, rows, L), dtype),
        grid_spec=pltpu.PrefetchScalarGridSpec(
            num_scalar_prefetch=0,
            grid=grid,
            in_specs=[
                pl.BlockSpec((1, amp2.shape[1], L), lambda i, j: (i, 0, 0)),   # amp
                pl.BlockSpec((1, bias2.shape[1], L), lambda i, j: (i, 0, 0)),  # bias
                pl.BlockSpec((1, row_tile, L), lambda i, j: (i, j, 0)),        # x tile
            ],
            out_specs=pl.BlockSpec((1, row_tile, L), lambda i, j: (i, j, 0)),
        ),
        compiler_params=pltpu.CompilerParams(
            dimension_semantics=("parallel", "parallel"),
            vmem_limit_bytes=vmem_limit,
        ),
    )(amp2, bias2, x2)

    return out2.reshape(N, S, H) if lane_dense else out2


def reference(x_i, q_i, w, b):
    """Pure-JAX reference matching the PyTorch forward (f32 compute)."""
    N, _, H = x_i.shape
    qt = q_i.astype(jnp.float32) @ w.astype(jnp.float32) + b.astype(jnp.float32)
    amp = qt[:, :H].reshape(N, 1, H)
    bias = qt[:, H:].reshape(N, 1, H)
    return (amp * x_i.astype(jnp.float32) + bias).astype(x_i.dtype)


if __name__ == "__main__":
    key = jax.random.PRNGKey(0)

    def make_case(case_key, N, C, H, S):
        kx, kq, kw, kb = jax.random.split(case_key, 4)
        x_i = jax.random.normal(kx, (N, S, H), dtype=jnp.float32)
        q_i = jax.random.normal(kq, (N, C), dtype=jnp.float32)
        # Deterministic synthetic "Linear(C, 2H)" params (not a checkpoint).
        bound = 1.0 / np.sqrt(C)
        w = jax.random.uniform(kw, (C, 2 * H), minval=-bound, maxval=bound,
                               dtype=jnp.float32)          # stored as (in, out) = W^T
        b = jax.random.uniform(kb, (1, 2 * H), minval=-bound, maxval=bound,
                               dtype=jnp.float32)
        return x_i, q_i, w, b

    cases = [
        # Nominal small module shape: size_per_code=4, hidden_dim=32, S=h*w*c=4*4*4.
        dict(N=2, C=4, H=32, S=64),
        # "Ragged" H: needs the lane-periodic slab (P=3, TP=24) + a masked tail block.
        dict(N=2, C=4, H=96, S=48),
        # S*H not foldable onto 128 lanes: exercises the (S, H) fallback layout.
        dict(N=2, C=4, H=24, S=10),
    ]
    for c in cases:
        key, sub = jax.random.split(key)
        x_i, q_i, w, b = make_case(sub, **c)
        out = jax.block_until_ready(siren_str_tfm(x_i, q_i, w, b))
        ref = reference(x_i, q_i, w, b)
        np.testing.assert_allclose(np.asarray(out), np.asarray(ref),
                                   rtol=1e-5, atol=1e-5)

    print("KERNEL_OK")
</pallas_src>

<mosaic_0001>
module attributes {stable_mosaic.version = 11 : i64} {
  func.func @siren_str_tfm_kernel(%arg0: i32, %arg1: i32, %arg2: memref<1x1x128xf32, #tpu.memory_space<vmem>>, %arg3: memref<1x1x128xf32, #tpu.memory_space<vmem>>, %arg4: memref<1x16x128xf32, #tpu.memory_space<vmem>>, %arg5: memref<1x16x128xf32, #tpu.memory_space<vmem>>) attributes {dimension_semantics = [#tpu.dimension_semantics<parallel>, #tpu.dimension_semantics<parallel>], iteration_bounds = array<i64: 2, 1>, scalar_prefetch = 0 : i64, scratch_operands = 0 : i64, tpu.core_type = #tpu.core_type<tc>, window_params = [{transform_indices = @transform_0, window_bounds = array<i64: 1, 1, 128>}, {transform_indices = @transform_1, window_bounds = array<i64: 1, 1, 128>}, {transform_indices = @transform_2, window_bounds = array<i64: 1, 16, 128>}, {transform_indices = @transform_3, window_bounds = array<i64: 1, 16, 128>}]} {
    %c0 = arith.constant 0 : index
    %c0_0 = arith.constant 0 : index
    %c0_1 = arith.constant 0 : index
    %0 = vector.load %arg4[%c0, %c0_0, %c0_1] : memref<1x16x128xf32, #tpu.memory_space<vmem>>, vector<1x16x128xf32>
    %c0_2 = arith.constant 0 : index
    %c0_3 = arith.constant 0 : index
    %c0_4 = arith.constant 0 : index
    %1 = vector.load %arg2[%c0_2, %c0_3, %c0_4] : memref<1x1x128xf32, #tpu.memory_space<vmem>>, vector<1x1x128xf32>
    %2 = vector.broadcast %1 : vector<1x1x128xf32> to vector<1x16x128xf32>
    %3 = arith.mulf %2, %0 : vector<1x16x128xf32>
    %c0_5 = arith.constant 0 : index
    %c0_6 = arith.constant 0 : index
    %c0_7 = arith.constant 0 : index
    %4 = vector.load %arg3[%c0_5, %c0_6, %c0_7] : memref<1x1x128xf32, #tpu.memory_space<vmem>>, vector<1x1x128xf32>
    %5 = vector.broadcast %4 : vector<1x1x128xf32> to vector<1x16x128xf32>
    %6 = arith.addf %3, %5 : vector<1x16x128xf32>
    %c0_8 = arith.constant 0 : index
    %c0_9 = arith.constant 0 : index
    %c0_10 = arith.constant 0 : index
    %7 = vector.load %arg5[%c0_8, %c0_9, %c0_10] : memref<1x16x128xf32, #tpu.memory_space<vmem>>, vector<1x16x128xf32>
    tpu.vector_store %arg5[%c0_8, %c0_9, %c0_10], %6 {strides = array<i32>} : memref<1x16x128xf32, #tpu.memory_space<vmem>>, vector<1x16x128xf32>,
    return
  }
  func.func @transform_0(%arg0: i32, %arg1: i32) -> (i32, i32, i32) {
    %c0_i32 = arith.constant 0 : i32
    %c0_i32_0 = arith.constant 0 : i32
    %c0_i32_1 = arith.constant 0 : i32
    return %arg0, %c0_i32, %c0_i32_0 : i32, i32, i32
  }
  func.func @transform_1(%arg0: i32, %arg1: i32) -> (i32, i32, i32) {
    %c0_i32 = arith.constant 0 : i32
    %c0_i32_0 = arith.constant 0 : i32
    %c0_i32_1 = arith.constant 0 : i32
    return %arg0, %c0_i32, %c0_i32_0 : i32, i32, i32
  }
  func.func @transform_2(%arg0: i32, %arg1: i32) -> (i32, i32, i32) {
    %c0_i32 = arith.constant 0 : i32
    %c0_i32_0 = arith.constant 0 : i32
    return %arg0, %arg1, %c0_i32 : i32, i32, i32
  }
  func.func @transform_3(%arg0: i32, %arg1: i32) -> (i32, i32, i32) {
    %c0_i32 = arith.constant 0 : i32
    %c0_i32_0 = arith.constant 0 : i32
    return %arg0, %arg1, %c0_i32 : i32, i32, i32
  }
}

</mosaic_0001>

<bundles_post_ra>
// kernel: tpu_custom_call.1
= control target key start
LH: loop header
LB: loop body
LE: loop exit
PB: predicated region body
PF: predicated region fallthrough
CT: control target
= control target key end

     0   :  { %s925_s0 = inlined_call_operand.hbm [shape: f32[2,1,128], index: 0, kind: input, shape index: {}]   ;;  %s926_s1 = inlined_call_operand.hbm [shape: f32[2,1,128], index: 1, kind: input, shape index: {}]   ;;  %s927_s2 = inlined_call_operand.hbm [shape: f32[2,16,128], index: 2, kind: input, shape index: {}]   ;;  %s928_s3 = inlined_call_operand.hbm [shape: f32[2,16,128], index: 3, kind: output, shape index: {}]  }
   0x1   :  { %930 = sst [smem:[#allocation13_spill]] %s925_s0 }
   0x2   :  { %931 = sst [smem:[#allocation14_spill]] %s926_s1 }
   0x3   :  { %8 = vsyncpa [#allocation3], 0 }
   0x4   :  { %10 = vsyncpa [#allocation3 + $0x1], 0 }
   0x5   :  { %11 = vsyncpa [#allocation6], 0 }
   0x6   :  { %13 = vsyncpa [#allocation6 + $0x1], 0 }
   0x7   :  { %14 = vsyncpa [#allocation4], 0 }
   0x8   :  { %16 = vsyncpa [#allocation4 + $0x1], 0  ;;  %s731_s12 = smov 0   ;;  %s733_s13 = smov 0  }
   0x9   :  { %s735_s14 = smov 0   ;;  %s737_s15 = smov 0  }
   0xa   :  { %s739_s16 = smov 0   ;;  %s741_s17 = smov 0  }
   0xb LB: > { %s762_s18 = sadd.s32 4294967295, %s701_s17   ;;  %s437_s19 = sadd.s32 4294967294, %s701_s17   ;;  %s701_s17 = sphi %s741_s17, %s22_s17   ;;  %s697_s16 = sphi %s739_s16, %s947_s16   ;;  %s693_s15 = sphi %s737_s15, %s946_s15   ;;  %s689_s14 = sphi %s735_s14, %s945_s14   ;;  %s685_s13 = sphi %s733_s13, %s944_s13   ;;  %s681_s12 = sphi %s731_s12, %s943_s12  }
   0xc   : > { %s34_s20 = sadd.s32 1, %s697_s16  ;;  %s41_s21 = sadd.s32 1, %s689_s14 }
   0xd   : > { %p36_p0 = scmp.ge.s32.totalorder %s34_s20, 2  ;;  %p48_p1 = scmp.ne.s32.totalorder %s689_s14, %s685_s13 }
   0xe   : > { %p49_p2 = scmp.eq.s32.totalorder %s701_s17, 0  ;;  %p54_p3 = scmp.ne.s32.totalorder %s685_s13, %s681_s12 }
   0xf   : > { %s949_s20 = smov (%p36_p0, %s34_s20), 0  ;;  %p55_p5 = scmp.eq.s32.totalorder %s762_s18, 0 }
  0x10   : > { %932 = sst [smem:[#allocation12_spill]] %s949_s20  ;;  %p774_p4 = por %p49_p2, %p48_p1 }
  0x11   : > { %s38_s23 = ssub.s32 %s697_s16, %s949_s20  ;;  %p134_p6 = scmp.eq.s32.totalorder %s762_s18, 1 }
  0x12   : > { %p39_p7 = scmp.eq.s32.totalorder %s38_s23, 0  ;;  %p782_p8 = por %p55_p5, %p54_p3 }
  0x13   : > { %p786_p9 = por %p134_p6, %p48_p1  ;;  %p140_p10 = scmp.eq.s32.totalorder %s437_s19, 1 }
  0x14   : > { %s791_s26 = scalar_select %p39_p7, %s689_s14, %s41_s21  }
  0x15   : > { %p793_p11 = por %p140_p10, %p54_p3  ;;  %p439_p12 = scmp.ge.s32.totalorder %s701_s17, 2 }
  0x16   : > { %p479_p13 = scmp.lt.s32.totalorder %s701_s17, 2  ;;  %s800_s28 = sand.u32 1, %s689_s14  }
  0x17   : > { %s440_s29 = sshll.u32 %s697_s16, 4  ;;  %s177_s30 = sand.u32 1, %s701_s17  }
  0x18   : > { %p806_p0 = pnand %p479_p13, %p774_p4  ;;  %s938_s1 = sld [smem:[#allocation14_spill]] }
  0x19   : > { %s180_s8 = scalar_lea.vmem [#allocation5], %s800_s28  ;;  %s815_s11 = scalar_lea.sflag [#allocation6], %s177_s30 }
  0x1a   : > { %s187_s9 = sshll.u32 %s180_s8, 4  ;;  %p535_p1 = pneg %p806_p0  ;;  %s188_s9 = int_to_ptr.vmem [resolvable:$true] %s187_s9 }
  0x1b   : > { %s546_s19 = scalar_lea.vmem %s188_s9, 16  ;;  %s703_s21 = smov [#allocation5]  }
  0x1c   : > { %p547_p2 = scmp.ne.s32.totalorder %s188_s9, %s546_s19  ;;  %s551_s22 = sshll.u32 %s703_s21, 4  ;;  %s552_s22 = int_to_ptr.vmem [resolvable:$false] %s551_s22 }
  0x1d   : > { %s553_s23 = scalar_lea.vmem %s552_s22, 32  ;;  %p554_p5 = scmp.lt.s32.totalorder %s188_s9, %s552_s22 }
  0x1e   : > { %s185_s7 = scalar_lea.hbm %s938_s1, %s440_s29  ;;  %p549_p3 = pnand %p547_p2, %p535_p1 }
  0x1f   : > { %p555_p6 = scmp.lt.s32.totalorder %s553_s23, %s546_s19 }
  0x20   : > { %p550_p4 = pneg %p549_p3 }
  0x21   : > { %p556_p7 = por %p555_p6, %p554_p5 }
  0x23   : > { %p557_p10 = pnand %p556_p7, %p550_p4 }
  0x25   : > { %560 = shalt.err (!%p557_p10)
}
  0x26   : > { %471 = dma.hbm_to_vmem [thread:$0]  (!%p806_p0), %s185_s7, 16, %s188_s9, %s815_s11  }
  0x27   : > { %p445_p13 = scmp.ge.s32.totalorder %s701_s17, 1  ;;  %p215_p2 = scmp.lt.s32.totalorder %s701_s17, 3 }
  0x28   : > { %s940_s0 = sld [smem:[#allocation13_spill]]  ;;  %s163_s19 = scalar_lea.vmem [#allocation2], %s800_s28 }
  0x29   : > { %p827_p3 = pnand %p445_p13, %p215_p2  ;;  %s170_s21 = sshll.u32 %s163_s19, 4  ;;  %s171_s21 = int_to_ptr.vmem [resolvable:$true] %s170_s21 }
  0x2a   : > { %s455_s22 = sshll.u32 %s697_s16, 8  ;;  %s161_s23 = scalar_lea.sflag [#allocation3], %s800_s28 }
  0x2b   : > { %s574_s10 = scalar_lea.vmem %s171_s21, 16  ;;  %s704_s7 = smov [#allocation2]  }
  0x2c   : > { %p575_p4 = scmp.ne.s32.totalorder %s171_s21, %s574_s10  ;;  %s579_s9 = sshll.u32 %s704_s7, 4  ;;  %s580_s9 = int_to_ptr.vmem [resolvable:$false] %s579_s9 }
  0x2d   : > { %s581_s1 = scalar_lea.vmem %s580_s9, 32  ;;  %p582_p7 = scmp.lt.s32.totalorder %s171_s21, %s580_s9 }
  0x2e   : > { %s168_s8 = scalar_lea.hbm %s940_s0, %s440_s29  ;;  %p577_p5 = pnand %p575_p4, %p535_p1 }
  0x2f   : > { %p583_p10 = scmp.lt.s32.totalorder %s581_s1, %s574_s10 }
  0x30   : > { %p578_p6 = pneg %p577_p5 }
  0x31   : > { %p584_p13 = por %p583_p10, %p582_p7 }
  0x33   : > { %p585_p2 = pnand %p584_p13, %p578_p6 }
  0x35   : > { %588 = shalt.err (!%p585_p2)
}
  0x36   : > { %468 = dma.hbm_to_vmem [thread:$0]  (!%p806_p0), %s168_s8, 16, %s171_s21, %s161_s23  }
  0x37   : > { %s206_s6 = scalar_lea.hbm %s927_s2, %s455_s22  ;;  %s941_s19 = sshll.u32 %s800_s28, 4 }
  0x38   : > { %s198_s0 = scalar_lea.vmem [#allocation7], %s941_s19  ;;  %s705_s1 = smov [#allocation7]  }
  0x39   : > { %s207_s20 = sshll.u32 %s198_s0, 4  ;;  %s607_s10 = sshll.u32 %s705_s1, 4  ;;  %s208_s20 = int_to_ptr.vmem [resolvable:$true] %s207_s20  ;;  %s608_s10 = int_to_ptr.vmem [resolvable:$false] %s607_s10 }
  0x3a   : > { %s602_s7 = scalar_lea.vmem %s208_s20, 256  ;;  %s609_s9 = scalar_lea.vmem %s608_s10, 512 }
  0x3b   : > { %p603_p4 = scmp.ne.s32.totalorder %s208_s20, %s602_s7  ;;  %p610_p7 = scmp.lt.s32.totalorder %s208_s20, %s608_s10 }
  0x3c   : > { %p611_p10 = scmp.lt.s32.totalorder %s609_s9, %s602_s7 }
  0x3d   : > { %p605_p5 = pnand %p603_p4, %p535_p1 }
  0x3e   : > { %p612_p13 = por %p611_p10, %p610_p7 }
  0x3f   : > { %p606_p6 = pneg %p605_p5 }
  0x41   : > { %p613_p2 = pnand %p612_p13, %p606_p6 }
  0x43   : > { %616 = shalt.err (!%p613_p2)
}
  0x44   : > { %s706_s8 = smov 128   ;;  %s707_s0 = smov 8  }
  0x45   : > { %474 = dma.hbm_to_vmem [thread:$0]  (!%p806_p0), %s206_s6, 256, %s208_s20, %s815_s11, %s706_s8, %s706_s8, %s707_s0  }
  0x46   : > { %219 = sbr.rel (%p827_p3) target bundleno = 105 (0x69), region = 32  ;;  %s856_s28 = sand.u32 (!%p827_p3), 1, %s685_s13  }
  0x47   : > { %s222_s21 = scalar_lea.sflag (!%p827_p3), [#allocation3], %s856_s28  ;;  %s224_s22 = scalar_lea.vmem (!%p827_p3), [#allocation2], %s856_s28 }
  0x4b   : > { %668 = dma.done.wait (%p782_p8), %s222_s21, 16  }
  0x4c   : > { %670 = vsyncadd (%p782_p8), %s222_s21, 4294967280  ;;  %s229_s20 = sand.u32 1, %s762_s18   ;;  %s232_s11 = scalar_lea.vmem [#allocation5], %s856_s28 }
  0x4d   : > { %s230_s4 = scalar_lea.sflag [#allocation6], %s229_s20 }
  0x4e   : > { %672 = dma.done.wait (%p782_p8), %s230_s4, 272  }
  0x4f   : > { %674 = vsyncadd (%p782_p8), %s230_s4, 4294967024  ;;  %s446_s30 = sshll.u32 %s856_s28, 4  ;;  %s456_s5 = sshll.u32 %s693_s15, 8  ;;  %v448_v2 = vld [vmem:[%s224_s22] ss:$0 sm:$0xff] }
  0x50   : > { %s271_s23 = scalar_lea.vmem [#allocation8], %s446_s30  ;;  %s241_s6 = scalar_lea.vmem [#allocation7], %s446_s30  ;;  %v449_v5 = vld [vmem:[%s232_s11] ss:$0 sm:$0xff] }
  0x51   : > { %s312_s29 = sshll.u32 %s271_s23, 4  ;;  %v274_v0 = vld [vmem:[%s241_s6] sm:$0xff]  ;;  %v275_v1 = vld [vmem:[%s241_s6 + $0x8] sm:$0xff]  ;;  %s877_s19 = scalar_lea.hbm %s928_s3, %s456_s5  ;;  %s872_s29 = int_to_ptr.vmem [resolvable:$true] %s312_s29 }
  0x52   : > { %v283_v3 = vmul.f32 %v448_v2, %v274_v0  ;;  %v284_v4 = vmul.f32 %v448_v2, %v275_v1  ;;  %s297_s15 = scalar_lea.sflag [#allocation4], %s856_s28  ;;  %s617_s7 = scalar_lea.vmem %s872_s29, 256 }
  0x53   : > { %p618_p8 = scmp.ne.s32.totalorder %s872_s29, %s617_s7  ;;  %s708_s1 = smov [#allocation8]  }
  0x54   : > { %v292_v6 = vadd.f32 %v449_v5, %v283_v3  ;;  %v293_v7 = vadd.f32 %v449_v5, %v284_v4  ;;  %s621_s10 = sshll.u32 %s708_s1, 4  ;;  %s622_s10 = int_to_ptr.vmem [resolvable:$false] %s621_s10 }
  0x55   : > { %p619_p0 = pnand %p618_p8, %p786_p9  ;;  %s623_s9 = scalar_lea.vmem %s622_s10, 512 }
  0x56   : > { %294 = vst [vmem:[%s271_s23] sm:$0xff] %v292_v6  ;;  %295 = vst [vmem:[%s271_s23 + $0x8] sm:$0xff] %v293_v7  ;;  %p624_p3 = scmp.lt.s32.totalorder %s872_s29, %s622_s10  ;;  %p625_p4 = scmp.lt.s32.totalorder %s623_s9, %s617_s7 }
  0x57   : > { %p620_p1 = pneg %p619_p0 }
  0x58   : > { %p626_p5 = por %p625_p4, %p624_p3 }
  0x5a   : > { %p627_p6 = pnand %p626_p5, %p620_p1 }
  0x5c   : > { %630 = shalt.err (!%p627_p6)
}
  0x5d   : > { %s631_s8 = scalar_lea.hbm %s877_s19, 256  ;;  %s635_s22 = scalar_lea.hbm %s928_s3, 512 }
  0x5e   : > { %p632_p7 = scmp.ne.s32.totalorder %s877_s19, %s631_s8  ;;  %p636_p2 = scmp.lt.s32.totalorder %s877_s19, %s928_s3 }
  0x5f   : > { %p637_p8 = scmp.lt.s32.totalorder %s635_s22, %s631_s8 }
  0x60   : > { %p633_p10 = pnand %p632_p7, %p786_p9 }
  0x61   : > { %p638_p0 = por %p637_p8, %p636_p2 }
  0x62   : > { %p634_p13 = pneg %p633_p10 }
  0x64   : > { %p639_p1 = pnand %p638_p0, %p634_p13 }
  0x66   : > { %642 = shalt.err (!%p639_p1)
}
  0x67   : > { %s709_s11 = smov 128   ;;  %s710_s30 = smov 8  }
  0x68   : > { %463 = dma.vmem_to_hbm [thread:$0]  (%p786_p9), %s872_s29, 256, %s877_s19, %s297_s15, %s709_s11, %s709_s11, %s710_s30  }
  0x69 PF: > { %s327_s23 = sand.u32 1, %s681_s12   ;;  %p476_p3 = pnand %p439_p12, %p793_p11 }
  0x6a   : > { %s328_s5 = scalar_lea.sflag [#allocation4], %s327_s23 }
  0x6b   : > { %p477_p4 = pneg %p476_p3 }
  0x6d   : > { %676 = dma.done.wait (%p477_p4), %s328_s5, 256  }
  0x6e   : > { %678 = vsyncadd (%p477_p4), %s328_s5, 4294967040  ;;  %s22_s17 = sadd.s32 1, %s701_s17   ;;  %s942_s25 = sld [smem:[#allocation12_spill]] }
  0x6f   : > { %p19_p5 = scmp.ge.s32.totalorder %s22_s17, 4   ;;  %s943_s12 = smov %s685_s13 }
  0x70   : > { %s944_s13 = smov %s689_s14  ;;  %s945_s14 = smov %s791_s26 }
  0x71   : > { %s946_s15 = smov %s697_s16  ;;  %21 = sbr.rel (!%p19_p5) target bundleno = 11 (0xb), region = 101 }
  0x74   : > { %s947_s16 = smov %s942_s25 }
  0x76   :  { %333 = vsyncpa [#allocation3], 1 }
  0x77   :  { %335 = vsyncpa [#allocation3 + $0x1], 1 }
  0x78   :  { %336 = vsyncpa [#allocation6], 1 }
  0x79   :  { %338 = vsyncpa [#allocation6 + $0x1], 1 }
  0x7a   :  { %339 = vsyncpa [#allocation4], 1 }
  0x7b   :  { %341 = vsyncpa [#allocation4 + $0x1], 1 }

</bundles_post_ra>
